<compile_context>
chip_gen: v5e
topology: v5e:2x2
jax: 0.10.0
libtpu: 0.0.40
codegen_flags: <defaults>
</compile_context>

<pallas_src>
import functools

import jax
import jax.numpy as jnp
from jax import lax
from jax.experimental import pallas as pl
from jax.experimental.pallas import tpu as pltpu

# Pad value: squared distances to/from padded points are ~1e30 -- far larger
# than any realistic point-set distance, with no f32 overflow anywhere.
_SENTINEL = 1e15


def _round_up(x, m):
    return ((x + m - 1) // m) * m


def _ahd_kernel(set1_ref, set2t_ref, yy_ref, rowsum_ref, colmin_out_ref,
                colmin_ref, rowacc_ref, *,
                n_rows, tm, steps_per_split, use_mxu, mask_rows):
    """Grid = (n_split, steps_per_split); one step = a (tm, D) tile of set1
    against all of (padded) set2.

    Outputs (written once per split, at the last inner step):
      rowsum_ref:     (8, 128)    partial sum of sqrt(row-min d2) for this split
      colmin_out_ref: (8, M_pad)  partial column-min of d2 for this split
    Scratch (per-core accumulators):
      colmin_ref: (1, M_pad)  running min of d2 over processed rows of set1
      rowacc_ref: (tm, 1)     running per-slot sum of sqrt(row-min d2)
    """
    c = pl.program_id(0)          # split index ("parallel" -> megacore split)
    i = pl.program_id(1)          # step inside the split ("arbitrary")

    x = set1_ref[...].astype(jnp.float32)                    # (tm, D)

    if use_mxu:
        # d2 = ||x||^2 + ||y||^2 - 2 x @ y^T ; y^T (D, M_pad) and ||y||^2
        # (1, M_pad) are precomputed once in the wrapper.
        yt = set2t_ref[...]
        yy = yy_ref[...]
        xx = jnp.sum(x * x, axis=1, keepdims=True)            # (tm, 1)
        xy = lax.dot_general(
            x, yt, dimension_numbers=(((1,), (0,)), ((), ())),
            preferred_element_type=jnp.float32)               # (tm, M_pad)
        d2 = jnp.maximum(xx + yy - 2.0 * xy, 0.0)
    else:
        # Direct-diff VPU formulation against the lane-dense (D, M_pad)
        # transposed copy of set2 (exact; no cancellation).
        yt = set2t_ref[...]                                    # (D, M_pad)
        d_dim = x.shape[1]
        d2 = None
        for k in range(d_dim):                                 # static unroll
            diff = x[:, k:k + 1] - yt[k:k + 1, :]              # (tm, M_pad)
            sq = diff * diff
            d2 = sq if d2 is None else d2 + sq

    # sqrt is monotone, so mins commute with it: reduce squared distances.
    row_min2 = jnp.min(d2, axis=1, keepdims=True)              # (tm, 1)
    col_min2 = jnp.min(d2, axis=0, keepdims=True)              # (1, M_pad)

    @pl.when(i == 0)
    def _init():
        rowacc_ref[...] = jnp.zeros(rowacc_ref.shape, rowacc_ref.dtype)
        colmin_ref[...] = jnp.full(colmin_ref.shape, jnp.inf, colmin_ref.dtype)

    row_sqrt = jnp.sqrt(row_min2)                              # tm sqrts/step
    if mask_rows:
        # Sentinel-padded rows of set1 must not contribute to term_1.
        base = (c * steps_per_split + i) * tm
        ridx = base + lax.broadcasted_iota(jnp.int32, (tm, 1), 0)
        row_sqrt = jnp.where(ridx < n_rows, row_sqrt, 0.0)
    rowacc_ref[...] = rowacc_ref[...] + row_sqrt
    colmin_ref[...] = jnp.minimum(colmin_ref[...], col_min2)

    @pl.when(i == pl.num_programs(1) - 1)
    def _finalize():
        rowsum_ref[...] = jnp.full(rowsum_ref.shape,
                                   jnp.sum(rowacc_ref[...]),
                                   dtype=jnp.float32)
        colmin_out_ref[...] = jnp.broadcast_to(colmin_ref[...],
                                               colmin_out_ref.shape)


def averaged_hausdorff_loss(set1, set2, *, tm=None, mxu_min_d=16):
    """Averaged Hausdorff Distance between two point sets.

    set1: (N, D) float array, set2: (M, D) float array. Returns a scalar.
    """
    assert set1.ndim == 2, f"got {set1.ndim}"
    assert set2.ndim == 2, f"got {set2.ndim}"
    assert set1.shape[1] == set2.shape[1], (
        "points in both sets must have the same dimensionality")
    N, D = set1.shape
    M, _ = set2.shape

    M_pad = _round_up(M, 128)                 # lane-dense columns
    use_mxu = D >= mxu_min_d

    # ---- Chip-aware VMEM budget -> row tile size + explicit vmem limit ----
    try:
        vmem_cap = int(pltpu.get_tpu_info().vmem_capacity_bytes)
    except Exception:                         # pragma: no cover
        vmem_cap = 64 << 20                   # conservative (v7x) fallback
    vmem_limit = int(min(vmem_cap * 0.7, 112 << 20))

    # Per-tile-row f32 bytes: d2 tile + ~3x VPU temporaries + 2x (double
    # buffered) set1 tile row.  Fixed: 2x set2^T, yy, colmin scratch/outs,
    # plus slack for compiler-internal scratch.
    per_row = 4 * (4 * M_pad + 2 * D)
    fixed = 4 * (2 * D * M_pad + 6 * M_pad) + (2 << 20)
    tm_cap = (int(vmem_limit * 0.8) - fixed) // per_row
    tm_cap = int(max(8, min(4096, tm_cap)))

    if tm is None:
        if N <= tm_cap:
            tm = _round_up(N, 8)              # single step per split
        else:
            # 256-aligned tiles fill the 2x256x256 MXU on v6e/v7x.
            align = 256 if (use_mxu and tm_cap >= 256) else 8
            tm = (tm_cap // align) * align
    assert tm >= 8 and tm % 8 == 0, "row tile must be a multiple of 8"

    n_tiles = (N + tm - 1) // tm
    # Two-way split over N: feeds both TensorCores on v7x; on 1-TC chips it is
    # the same sequential loop with one extra (tiny) partial output.
    n_split = 2 if n_tiles >= 2 else 1
    steps_per_split = (n_tiles + n_split - 1) // n_split
    n_pad = n_split * steps_per_split * tm
    mask_rows = n_pad > N

    set1f = set1.astype(jnp.float32)
    set2f = set2.astype(jnp.float32)
    if n_pad > N:
        set1f = jnp.concatenate(
            [set1f, jnp.full((n_pad - N, D), _SENTINEL, jnp.float32)], axis=0)
    if M_pad > M:
        set2f = jnp.concatenate(
            [set2f, jnp.full((M_pad - M, D), _SENTINEL, jnp.float32)], axis=0)

    set2t = set2f.T                                      # (D, M_pad), lane-dense
    yy = jnp.sum(set2t * set2t, axis=0, keepdims=True)   # (1, M_pad), hoisted

    kernel = functools.partial(
        _ahd_kernel, n_rows=N, tm=tm, steps_per_split=steps_per_split,
        use_mxu=use_mxu, mask_rows=mask_rows)

    rowsum, colmin = pl.pallas_call(
        kernel,
        out_shape=(
            jax.ShapeDtypeStruct((n_split * 8, 128), jnp.float32),
            jax.ShapeDtypeStruct((n_split * 8, M_pad), jnp.float32),
        ),
        grid=(n_split, steps_per_split),
        in_specs=[
            pl.BlockSpec((tm, D), lambda c, i: (c * steps_per_split + i, 0)),
            pl.BlockSpec((D, M_pad), lambda c, i: (0, 0)),   # set2^T, resident
            pl.BlockSpec((1, M_pad), lambda c, i: (0, 0)),   # ||y||^2, resident
        ],
        out_specs=[
            pl.BlockSpec((8, 128), lambda c, i: (c, 0)),     # partial row sums
            pl.BlockSpec((8, M_pad), lambda c, i: (c, 0)),   # partial col mins
        ],
        scratch_shapes=[
            pltpu.VMEM((1, M_pad), jnp.float32),             # running col mins
            pltpu.VMEM((tm, 1), jnp.float32),                # running row sums
        ],
        compiler_params=pltpu.CompilerParams(
            dimension_semantics=("parallel", "arbitrary"),
            vmem_limit_bytes=vmem_limit),
    )(set1f, set2t, yy)

    # Combine per-split partials (tiny XLA epilogue).
    term_1 = jnp.sum(rowsum.reshape(n_split, 8, 128)[:, 0, 0]) / jnp.float32(N)
    col_min = jnp.min(colmin.reshape(n_split, 8, M_pad)[:, 0, :M], axis=0)
    term_2 = jnp.mean(jnp.sqrt(col_min))
    return term_1 + term_2


def _reference(set1, set2):
    # Pure-JAX reference matching the PyTorch module exactly.
    diff = set1[:, None, :] - set2[None, :, :]
    d = jnp.sqrt(jnp.sum(diff ** 2, axis=-1))
    return jnp.mean(jnp.min(d, axis=1)) + jnp.mean(jnp.min(d, axis=0))


if __name__ == "__main__":
    key = jax.random.PRNGKey(0)
    k1, k2, k3, k4, k5, k6 = jax.random.split(key, 6)

    # 1) Typical small 2-D point sets (direct-diff VPU path; M=96 -> padded
    #    to 128 lanes, column masking via sentinel + wrapper slice).
    s1 = jax.random.normal(k1, (128, 2), dtype=jnp.float32) * 4.0
    s2 = jax.random.normal(k2, (96, 2), dtype=jnp.float32) * 4.0 + 1.0
    loss = jax.block_until_ready(averaged_hausdorff_loss(s1, s2))
    ref = _reference(s1, s2)
    assert jnp.allclose(loss, ref, rtol=1e-4, atol=1e-4), (loss, ref)

    # 2) Ragged N + forced small tile -> multi-step accumulation, 2-way
    #    parallel split, sentinel row padding + masking.
    s3 = jax.random.normal(k3, (250, 2), dtype=jnp.float32) * 10.0
    s4 = jax.random.normal(k4, (96, 2), dtype=jnp.float32) * 10.0
    loss2 = jax.block_until_ready(averaged_hausdorff_loss(s3, s4, tm=64))
    ref2 = _reference(s3, s4)
    assert jnp.allclose(loss2, ref2, rtol=1e-4, atol=1e-4), (loss2, ref2)

    # 3) Higher-dimensional points -> MXU expansion path (hoisted yy,
    #    canonical (tm,D)@(D,M) contraction).
    s5 = jax.random.normal(k5, (128, 64), dtype=jnp.float32)
    s6 = jax.random.normal(k6, (128, 64), dtype=jnp.float32)
    loss3 = jax.block_until_ready(averaged_hausdorff_loss(s5, s6))
    ref3 = _reference(s5, s6)
    assert jnp.allclose(loss3, ref3, rtol=1e-3, atol=1e-3), (loss3, ref3)

    print("KERNEL_OK")
</pallas_src>

<mosaic_0001>
module attributes {stable_mosaic.version = 11 : i64} {
  func.func @_ahd_kernel(%arg0: i32, %arg1: i32, %arg2: memref<128x2xf32, #tpu.memory_space<vmem>>, %arg3: memref<2x128xf32, #tpu.memory_space<vmem>>, %arg4: memref<1x128xf32, #tpu.memory_space<vmem>>, %arg5: memref<8x128xf32, #tpu.memory_space<vmem>>, %arg6: memref<8x128xf32, #tpu.memory_space<vmem>>, %arg7: memref<1x128xf32, #tpu.memory_space<vmem>>, %arg8: memref<128x1xf32, #tpu.memory_space<vmem>>) attributes {dimension_semantics = [#tpu.dimension_semantics<parallel>, #tpu.dimension_semantics<arbitrary>], iteration_bounds = array<i64: 1, 1>, scalar_prefetch = 0 : i64, scratch_operands = 2 : i64, tpu.core_type = #tpu.core_type<tc>, window_params = [{transform_indices = @transform_0, window_bounds = array<i64: 128, 2>}, {pipeline_mode = #tpu.pipeline_mode<synchronous>, transform_indices = @transform_1, window_bounds = array<i64: 2, 128>}, {pipeline_mode = #tpu.pipeline_mode<synchronous>, transform_indices = @transform_2, window_bounds = array<i64: 1, 128>}, {transform_indices = @transform_3, window_bounds = array<i64: 8, 128>}, {transform_indices = @transform_4, window_bounds = array<i64: 8, 128>}]} {
    %c0 = arith.constant 0 : index
    %c0_0 = arith.constant 0 : index
    %0 = vector.load %arg2[%c0, %c0_0] : memref<128x2xf32, #tpu.memory_space<vmem>>, vector<128x2xf32>
    %c0_1 = arith.constant 0 : index
    %c0_2 = arith.constant 0 : index
    %1 = vector.load %arg3[%c0_1, %c0_2] : memref<2x128xf32, #tpu.memory_space<vmem>>, vector<2x128xf32>
    %2 = vector.extract_strided_slice %0 {offsets = [0, 0], sizes = [128, 1], strides = [1, 1]} : vector<128x2xf32> to vector<128x1xf32>
    %3 = vector.extract_strided_slice %1 {offsets = [0, 0], sizes = [1, 128], strides = [1, 1]} : vector<2x128xf32> to vector<1x128xf32>
    %4 = vector.broadcast %2 : vector<128x1xf32> to vector<128x128xf32>
    %5 = vector.broadcast %3 : vector<1x128xf32> to vector<128x128xf32>
    %6 = arith.subf %4, %5 : vector<128x128xf32>
    %7 = arith.mulf %6, %6 : vector<128x128xf32>
    %8 = vector.extract_strided_slice %0 {offsets = [0, 1], sizes = [128, 1], strides = [1, 1]} : vector<128x2xf32> to vector<128x1xf32>
    %9 = vector.extract_strided_slice %1 {offsets = [1, 0], sizes = [1, 128], strides = [1, 1]} : vector<2x128xf32> to vector<1x128xf32>
    %10 = vector.broadcast %8 : vector<128x1xf32> to vector<128x128xf32>
    %11 = vector.broadcast %9 : vector<1x128xf32> to vector<128x128xf32>
    %12 = arith.subf %10, %11 : vector<128x128xf32>
    %13 = arith.mulf %12, %12 : vector<128x128xf32>
    %14 = arith.addf %7, %13 : vector<128x128xf32>
    %cst = arith.constant dense<0x7F800000> : vector<128xf32>
    %15 = vector.multi_reduction <minimumf>, %14, %cst [1] : vector<128x128xf32> to vector<128xf32>
    %16 = vector.shape_cast %15 : vector<128xf32> to vector<128x1xf32>
    %cst_3 = arith.constant dense<0x7F800000> : vector<128xf32>
    %17 = vector.multi_reduction <minimumf>, %14, %cst_3 [0] : vector<128x128xf32> to vector<128xf32>
    %18 = vector.shape_cast %17 : vector<128xf32> to vector<1x128xf32>
    %c0_i32 = arith.constant 0 : i32
    %19 = arith.cmpi eq, %arg1, %c0_i32 : i32
    %20 = arith.extui %19 : i1 to i32
    %c0_i32_4 = arith.constant 0 : i32
    %21 = arith.cmpi ne, %20, %c0_i32_4 : i32
    scf.if %21 {
      %cst_15 = arith.constant 0.000000e+00 : f32
      %32 = vector.broadcast %cst_15 : f32 to vector<128x1xf32>
      %c0_16 = arith.constant 0 : index
      %c0_17 = arith.constant 0 : index
      %33 = vector.load %arg8[%c0_16, %c0_17] : memref<128x1xf32, #tpu.memory_space<vmem>>, vector<128x1xf32>
      tpu.vector_store %arg8[%c0_16, %c0_17], %32 {strides = array<i32>} : memref<128x1xf32, #tpu.memory_space<vmem>>, vector<128x1xf32>,
      %cst_18 = arith.constant 0x7F800000 : f32
      %34 = vector.broadcast %cst_18 : f32 to vector<1x128xf32>
      %c0_19 = arith.constant 0 : index
      %c0_20 = arith.constant 0 : index
      %35 = vector.load %arg7[%c0_19, %c0_20] : memref<1x128xf32, #tpu.memory_space<vmem>>, vector<1x128xf32>
      tpu.vector_store %arg7[%c0_19, %c0_20], %34 {strides = array<i32>} : memref<1x128xf32, #tpu.memory_space<vmem>>, vector<1x128xf32>,
    } else {
    }
    %22 = math.sqrt %16 : vector<128x1xf32>
    %c0_5 = arith.constant 0 : index
    %c0_6 = arith.constant 0 : index
    %23 = vector.load %arg8[%c0_5, %c0_6] : memref<128x1xf32, #tpu.memory_space<vmem>>, vector<128x1xf32>
    %24 = arith.addf %23, %22 : vector<128x1xf32>
    %c0_7 = arith.constant 0 : index
    %c0_8 = arith.constant 0 : index
    %25 = vector.load %arg8[%c0_7, %c0_8] : memref<128x1xf32, #tpu.memory_space<vmem>>, vector<128x1xf32>
    tpu.vector_store %arg8[%c0_7, %c0_8], %24 {strides = array<i32>} : memref<128x1xf32, #tpu.memory_space<vmem>>, vector<128x1xf32>,
    %c0_9 = arith.constant 0 : index
    %c0_10 = arith.constant 0 : index
    %26 = vector.load %arg7[%c0_9, %c0_10] : memref<1x128xf32, #tpu.memory_space<vmem>>, vector<1x128xf32>
    %27 = arith.minimumf %26, %18 : vector<1x128xf32>
    %c0_11 = arith.constant 0 : index
    %c0_12 = arith.constant 0 : index
    %28 = vector.load %arg7[%c0_11, %c0_12] : memref<1x128xf32, #tpu.memory_space<vmem>>, vector<1x128xf32>
    tpu.vector_store %arg7[%c0_11, %c0_12], %27 {strides = array<i32>} : memref<1x128xf32, #tpu.memory_space<vmem>>, vector<1x128xf32>,
    %c0_i32_13 = arith.constant 0 : i32
    %29 = arith.cmpi eq, %arg1, %c0_i32_13 : i32
    %30 = arith.extui %29 : i1 to i32
    %c0_i32_14 = arith.constant 0 : i32
    %31 = arith.cmpi ne, %30, %c0_i32_14 : i32
    scf.if %31 {
      %c0_15 = arith.constant 0 : index
      %c0_16 = arith.constant 0 : index
      %32 = vector.load %arg8[%c0_15, %c0_16] : memref<128x1xf32, #tpu.memory_space<vmem>>, vector<128x1xf32>
      %33 = vector.shape_cast %32 : vector<128x1xf32> to vector<1x128x1xf32>
      %cst_17 = arith.constant dense<0.000000e+00> : vector<1xf32>
      %34 = vector.multi_reduction <add>, %33, %cst_17 [1, 2] : vector<1x128x1xf32> to vector<1xf32>
      %35 = vector.shape_cast %34 : vector<1xf32> to vector<1x1x1xf32>
      %36 = vector.extract %35[0, 0, 0] : f32 from vector<1x1x1xf32>
      %37 = vector.broadcast %36 : f32 to vector<8x128xf32>
      %c0_18 = arith.constant 0 : index
      %c0_19 = arith.constant 0 : index
      %38 = vector.load %arg5[%c0_18, %c0_19] : memref<8x128xf32, #tpu.memory_space<vmem>>, vector<8x128xf32>
      tpu.vector_store %arg5[%c0_18, %c0_19], %37 {strides = array<i32>} : memref<8x128xf32, #tpu.memory_space<vmem>>, vector<8x128xf32>,
      %c0_20 = arith.constant 0 : index
      %c0_21 = arith.constant 0 : index
      %39 = vector.load %arg7[%c0_20, %c0_21] : memref<1x128xf32, #tpu.memory_space<vmem>>, vector<1x128xf32>
      %40 = vector.shape_cast %39 : vector<1x128xf32> to vector<1x128xf32>
      %41 = vector.broadcast %40 : vector<1x128xf32> to vector<8x128xf32>
      %c0_22 = arith.constant 0 : index
      %c0_23 = arith.constant 0 : index
      %42 = vector.load %arg6[%c0_22, %c0_23] : memref<8x128xf32, #tpu.memory_space<vmem>>, vector<8x128xf32>
      tpu.vector_store %arg6[%c0_22, %c0_23], %41 {strides = array<i32>} : memref<8x128xf32, #tpu.memory_space<vmem>>, vector<8x128xf32>,
    } else {
    }
    return
  }
  func.func @transform_0(%arg0: i32, %arg1: i32) -> (i32, i32) {
    %c1_i32 = arith.constant 1 : i32
    %0 = arith.muli %arg0, %c1_i32 : i32
    %1 = arith.addi %0, %arg1 : i32
    %c0_i32 = arith.constant 0 : i32
    %c0_i32_0 = arith.constant 0 : i32
    return %1, %c0_i32 : i32, i32
  }
  func.func @transform_1(%arg0: i32, %arg1: i32) -> (i32, i32) {
    %c0_i32 = arith.constant 0 : i32
    %c0_i32_0 = arith.constant 0 : i32
    %c0_i32_1 = arith.constant 0 : i32
    return %c0_i32, %c0_i32_0 : i32, i32
  }
  func.func @transform_2(%arg0: i32, %arg1: i32) -> (i32, i32) {
    %c0_i32 = arith.constant 0 : i32
    %c0_i32_0 = arith.constant 0 : i32
    %c0_i32_1 = arith.constant 0 : i32
    return %c0_i32, %c0_i32_0 : i32, i32
  }
  func.func @transform_3(%arg0: i32, %arg1: i32) -> (i32, i32) {
    %c0_i32 = arith.constant 0 : i32
    %c0_i32_0 = arith.constant 0 : i32
    return %arg0, %c0_i32 : i32, i32
  }
  func.func @transform_4(%arg0: i32, %arg1: i32) -> (i32, i32) {
    %c0_i32 = arith.constant 0 : i32
    %c0_i32_0 = arith.constant 0 : i32
    return %arg0, %c0_i32 : i32, i32
  }
}

</mosaic_0001>

<bundles_post_ra>
// kernel: tpu_custom_call.1
= control target key start
LH: loop header
LB: loop body
LE: loop exit
PB: predicated region body
PF: predicated region fallthrough
CT: control target
= control target key end

     0   :  { %10 = vsyncpa [#allocation5], 0  ;;  %v815_v2 = vmov 1   ;;  %v816_v3 = vmov 0   ;;  %s1135_s0 = inlined_call_operand.vmem [shape: f32[128,2], index: 0, kind: input, shape index: {}]   ;;  %s1136_s1 = inlined_call_operand.vmem [shape: f32[2,128], index: 1, kind: input, shape index: {}]   ;;  %s1137_s2 = inlined_call_operand.vmem [shape: f32[1,128], index: 2, kind: input, shape index: {}]   ;;  %s1138_s3 = inlined_call_operand.hbm [shape: f32[8,128], index: 3, kind: output, shape index: {0}]   ;;  %s1139_s4 = inlined_call_operand.hbm [shape: f32[8,128], index: 4, kind: output, shape index: {1}]  }
   0x1   :  { %v42_v0 = vld [vmem:[%s1135_s0 + $0x10] sm:$0xff]  ;;  %v40_v1 = vld [vmem:[%s1135_s0] sm:$0xff]  ;;  %715 = vset.pattern.permute.xlu1 %v815_v2  ;;  %716 = vset.pattern.permute.xlu2 %v816_v3 }
   0x2   :  { %714 = vset.pattern.permute.xlu0 %v816_v3  ;;  %69 = vperm.xlu2 %716, %v42_v0  }
   0x3   :  { %11 = vsyncpa [#allocation7], 0  ;;  %171 = vperm.xlu1 %715, %v40_v1   ;;  %59 = vperm.xlu0 %714, %v40_v1   ;;  %v41_v4 = vld [vmem:[%s1135_s0 + $0x8] sm:$0xff]  ;;  %v43_v5 = vld [vmem:[%s1135_s0 + $0x18] sm:$0xff]  ;;  %vm340_vm0 = vcmask 7168   ;;  %s686_s23 = sshll.u32 %s1139_s4, 4  ;;  %s687_s23 = int_to_ptr.hbm [resolvable:$true] %s686_s23 }
   0x4   :  { %v44_v6 = vld [vmem:[%s1135_s0 + $0x20] sm:$0xff]  ;;  %v47_v7 = vld [vmem:[%s1135_s0 + $0x38] sm:$0xff]  ;;  %v45_v8 = vld [vmem:[%s1135_s0 + $0x28] sm:$0xff]  ;;  %s675_s26 = sshll.u32 %s1138_s3, 4  ;;  %s820_s27 = smov [#allocation4]   ;;  %s676_s26 = int_to_ptr.hbm [resolvable:$true] %s675_s26 }
   0x5   :  { %v52_v9 = vld [vmem:[%s1135_s0 + $0x60] sm:$0xff]  ;;  %v46_v10 = vld [vmem:[%s1135_s0 + $0x30] sm:$0xff]  ;;  %v49_v12 = vld [vmem:[%s1135_s0 + $0x48] sm:$0xff]  ;;  %s673_s28 = sshll.u32 %s820_s27, 4  ;;  %s674_s28 = int_to_ptr.vmem [resolvable:$true] %s673_s28 }
   0x6   :  { %v48_v11 = vld [vmem:[%s1135_s0 + $0x40] sm:$0xff]  ;;  %v54_v13 = vld [vmem:[%s1135_s0 + $0x70] sm:$0xff]  ;;  %v51_v15 = vld [vmem:[%s1135_s0 + $0x58] sm:$0xff] }
   0x7   :  { %v50_v14 = vld [vmem:[%s1135_s0 + $0x50] sm:$0xff]  ;;  %v53_v16 = vld [vmem:[%s1135_s0 + $0x68] sm:$0xff]  ;;  %v56_v17 = vld [vmem:[%s1136_s1] sm:$0x3] }
   0x8   :  { %v55_v19 = vld [vmem:[%s1135_s0 + $0x78] sm:$0xff]  ;;  %v904_v20 = vperm.slane %v56_v17, 0  ;;  %v908_v22 = vperm.slane %v56_v17, 1  ;;  %s819_s0 = smov [#allocation6]  }
   0x9   :  { %s684_s1 = sshll.u32 %s819_s0, 4  ;;  %s685_s1 = int_to_ptr.vmem [resolvable:$true] %s684_s1 }
   0xa   :  { %717 = vset.pattern.permute.xlu2 %v815_v2 }
   0xb   :  { %175 = vperm.xlu1 %715, %v41_v4   ;;  %64 = vperm.xlu0 %714, %v41_v4  }
   0xc   :  { %179 = vperm.xlu2 %717, %v42_v0  }
  0x13   :  { %183 = vperm.xlu1 %715, %v43_v5   ;;  %74 = vperm.xlu0 %714, %v43_v5  }
  0x14   :  { %718 = vset.pattern.permute.xlu2 %v816_v3 }
  0x15   :  { %79 = vperm.xlu2 %718, %v44_v6  }
  0x1b   :  { %719 = vset.pattern.permute.xlu1 %v816_v3  ;;  %94 = vperm.xlu0 %714, %v47_v7  }
  0x1c   :  { %84 = vperm.xlu1 %719, %v45_v8  }
  0x1d   :  { %720 = vset.pattern.permute.xlu2 %v815_v2 }
  0x1e   :  { %191 = vperm.xlu2 %720, %v45_v8  }
  0x23   :  { %119 = vperm.xlu0 %714, %v52_v9  }
  0x24   :  { %89 = vperm.xlu1 %719, %v46_v10  }
  0x26   :  { %195 = vperm.xlu2 %720, %v46_v10  }
  0x2b   :  { %725 = vset.pattern.permute.xlu0 %v815_v2 }
  0x2c   :  { %721 = vset.pattern.permute.xlu1 %v815_v2  ;;  %187 = vperm.xlu0 %725, %v44_v6  }
  0x2d   :  { %199 = vperm.xlu1 %721, %v47_v7  }
  0x2e   :  { %722 = vset.pattern.permute.xlu2 %v816_v3 }
  0x2f   :  { %99 = vperm.xlu2 %722, %v48_v11  }
  0x34   :  { %207 = vperm.xlu0 %725, %v49_v12  }
  0x35   :  { %203 = vperm.xlu1 %721, %v48_v11  }
  0x37   :  { %104 = vperm.xlu2 %722, %v49_v12  }
  0x3c   :  { %227 = vperm.xlu0 %725, %v54_v13  }
  0x3d   :  { %723 = vset.pattern.permute.xlu1 %v816_v3 }
  0x3e   :  { %109 = vperm.xlu1 %723, %v50_v14  }
  0x3f   :  { %724 = vset.pattern.permute.xlu2 %v815_v2 }
  0x40   :  { %211 = vperm.xlu2 %724, %v50_v14  }
  0x46   :  { %114 = vperm.xlu1 %723, %v51_v15  }
  0x48   :  { %215 = vperm.xlu2 %724, %v51_v15  }
  0x4e   :  { %726 = vset.pattern.permute.xlu1 %v815_v2 }
  0x4f   :  { %219 = vperm.xlu1 %726, %v52_v9  }
  0x50   :  { %727 = vset.pattern.permute.xlu2 %v816_v3 }
  0x51   :  { %124 = vperm.xlu2 %727, %v53_v16  }
  0x57   :  { %223 = vperm.xlu1 %726, %v53_v16  }
  0x59   :  { %129 = vperm.xlu2 %727, %v54_v13  }
  0x5c   :  { %v70_v18 = vpop.permute.xlu2 %69 }
  0x5d   :  { %v140_v21 = vsub.f32 %v70_v18, %v904_v20 }
  0x5f   :  { %728 = vset.pattern.permute.xlu1 %v816_v3  ;;  %v156_v24 = vmul.f32 %v140_v21, %v140_v21 }
  0x60   :  { %134 = vperm.xlu1 %728, %v55_v19  }
  0x61   :  { %729 = vset.pattern.permute.xlu2 %v815_v2 }
  0x62   :  { %231 = vperm.xlu2 %729, %v55_v19  }
  0x66   :  { %v180_v23 = vpop.permute.xlu2 %179 }
  0x67   :  { %v237_v25 = vsub.f32 %v180_v23, %v908_v22 }
  0x69   :  { %v253_v26 = vmul.f32 %v237_v25, %v237_v25 }
  0x6b   :  { %v911_v27 = vadd.f32 %v253_v26, %v156_v24 }
  0x6d   :  { %287 = vmin.xlane.f32.xlu0 %v911_v27 }
  0x6f   :  { %v80_v28 = vpop.permute.xlu2 %79 }
  0x70   :  { %v142_v5 = vsub.f32 %v80_v28, %v904_v20 }
  0x72   :  { %v158_v9 = vmul.f32 %v142_v5, %v142_v5 }
  0x75   :  { %v172_v29 = vpop.permute.xlu1 %171  ;;  %v60_v30 = vpop.permute.xlu0 %59 }
  0x76   :  { %v235_v34 = vsub.f32 %v172_v29, %v908_v22  ;;  %v138_v35 = vsub.f32 %v60_v30, %v904_v20 }
  0x78   :  { %v192_v31 = vpop.permute.xlu2 %191  ;;  %v251_v39 = vmul.f32 %v235_v34, %v235_v34  ;;  %v154_v40 = vmul.f32 %v138_v35, %v138_v35 }
  0x79   :  { %v240_v54 = vsub.f32 %v192_v31, %v908_v22 }
  0x7a   :  { %v918_v45 = vadd.f32 %v251_v39, %v154_v40 }
  0x7b   :  { %v256_v58 = vmul.f32 %v240_v54, %v240_v54 }
  0x7d   :  { %v176_v32 = vpop.permute.xlu1 %175  ;;  %v65_v33 = vpop.permute.xlu0 %64 }
  0x7e   :  { %v236_v37 = vsub.f32 %v176_v32, %v908_v22  ;;  %v139_v38 = vsub.f32 %v65_v33, %v904_v20 }
  0x80   :  { %v196_v36 = vpop.permute.xlu2 %195  ;;  %v252_v41 = vmul.f32 %v236_v37, %v236_v37  ;;  %v155_v42 = vmul.f32 %v139_v38, %v139_v38 }
  0x81   :  { %v241_v59 = vsub.f32 %v196_v36, %v908_v22 }
  0x82   :  { %v922_v49 = vadd.f32 %v252_v41, %v155_v42 }
  0x83   :  { %v257_v0 = vmul.f32 %v241_v59, %v241_v59 }
  0x85   :  { %v184_v43 = vpop.permute.xlu1 %183  ;;  %v75_v44 = vpop.permute.xlu0 %74 }
  0x86   :  { %v238_v46 = vsub.f32 %v184_v43, %v908_v22  ;;  %v141_v47 = vsub.f32 %v75_v44, %v904_v20 }
  0x88   :  { %v254_v50 = vmul.f32 %v238_v46, %v238_v46  ;;  %v157_v51 = vmul.f32 %v141_v47, %v141_v47  ;;  %v817_v46 = vmov inf  }
  0x89   :  { %v100_v48 = vpop.permute.xlu2 %99  ;;  %357 = vst [vmem:[#allocation2] sm:$0x1] %v817_v46 }
  0x8a   :  { %283 = vmin.xlane.f32.xlu1 %v918_v45  ;;  %v928_v56 = vadd.f32 %v254_v50, %v157_v51  ;;  %v146_v15 = vsub.f32 %v100_v48, %v904_v20 }
  0x8b   :  { %285 = vmin.xlane.f32.xlu2 %v922_v49 }
  0x8c   :  { %v162_v28 = vmul.f32 %v146_v15, %v146_v15 }
  0x8d   :  { %v95_v52 = vpop.permute.xlu0 %94 }
  0x8e   :  { %v85_v53 = vpop.permute.xlu1 %84  ;;  %v145_v13 = vsub.f32 %v95_v52, %v904_v20 }
  0x8f   :  { %v143_v55 = vsub.f32 %v85_v53, %v904_v20 }
  0x90   :  { %v161_v24 = vmul.f32 %v145_v13, %v145_v13  ;;  %v818_v13 = vmov 0.0  }
  0x91   :  { %v105_v57 = vpop.permute.xlu2 %104  ;;  %v159_v60 = vmul.f32 %v143_v55, %v143_v55  ;;  %343 = vst.msk [vmem:[#allocation3 + $0x10] sm:$0xff] %vm340_vm0, %v818_v13 }
  0x92   :  { %v147_v14 = vsub.f32 %v105_v57, %v904_v20  ;;  %341 = vst.msk [vmem:[#allocation3] sm:$0xff] %vm340_vm0, %v818_v13 }
  0x93   :  { %289 = vmin.xlane.f32.xlu2 %v928_v56  ;;  %v933_v2 = vadd.f32 %v256_v58, %v159_v60  ;;  %342 = vst.msk [vmem:[#allocation3 + $0x8] sm:$0xff] %vm340_vm0, %v818_v13 }
  0x94   :  { %v163_v25 = vmul.f32 %v147_v14, %v147_v14  ;;  %344 = vst.msk [vmem:[#allocation3 + $0x18] sm:$0xff] %vm340_vm0, %v818_v13 }
  0x95   :  { %v120_v61 = vpop.permute.xlu0 %119  ;;  %v316_v5 = vmin.f32 %v922_v49, %v933_v2  ;;  %345 = vst.msk [vmem:[#allocation3 + $0x20] sm:$0xff] %vm340_vm0, %v818_v13 }
  0x96   :  { %v90_v62 = vpop.permute.xlu1 %89  ;;  %v150_v53 = vsub.f32 %v120_v61, %v904_v20  ;;  %346 = vst.msk [vmem:[#allocation3 + $0x28] sm:$0xff] %vm340_vm0, %v818_v13 }
  0x97   :  { %v144_v63 = vsub.f32 %v90_v62, %v904_v20  ;;  %347 = vst.msk [vmem:[#allocation3 + $0x30] sm:$0xff] %vm340_vm0, %v818_v13 }
  0x98   :  { %v166_v59 = vmul.f32 %v150_v53, %v150_v53  ;;  %348 = vst.msk [vmem:[#allocation3 + $0x38] sm:$0xff] %vm340_vm0, %v818_v13 }
  0x99   :  { %v160_v1 = vmul.f32 %v144_v63, %v144_v63  ;;  %349 = vst.msk [vmem:[#allocation3 + $0x40] sm:$0xff] %vm340_vm0, %v818_v13 }
  0x9a   :  { %v212_v4 = vpop.permute.xlu2 %211  ;;  %350 = vst.msk [vmem:[#allocation3 + $0x48] sm:$0xff] %vm340_vm0, %v818_v13 }
  0x9b   :  { %293 = vmin.xlane.f32.xlu2 %v933_v2  ;;  %v936_v3 = vadd.f32 %v257_v0, %v160_v1  ;;  %v245_v33 = vsub.f32 %v212_v4, %v908_v22  ;;  %351 = vst.msk [vmem:[#allocation3 + $0x50] sm:$0xff] %vm340_vm0, %v818_v13 }
  0x9c   :  { %352 = vst.msk [vmem:[#allocation3 + $0x58] sm:$0xff] %vm340_vm0, %v818_v13 }
  0x9d   :  { %295 = vmin.xlane.f32.xlu0 %v936_v3  ;;  %v261_v36 = vmul.f32 %v245_v33, %v245_v33  ;;  %353 = vst.msk [vmem:[#allocation3 + $0x60] sm:$0xff] %vm340_vm0, %v818_v13 }
  0x9e   :  { %v188_v6 = vpop.permute.xlu0 %187  ;;  %354 = vst.msk [vmem:[#allocation3 + $0x68] sm:$0xff] %vm340_vm0, %v818_v13 }
  0x9f   :  { %v239_v7 = vsub.f32 %v188_v6, %v908_v22  ;;  %v200_v8 = vpop.permute.xlu1 %199  ;;  %355 = vst.msk [vmem:[#allocation3 + $0x70] sm:$0xff] %vm340_vm0, %v818_v13 }
  0xa0   :  { %v242_v11 = vsub.f32 %v200_v8, %v908_v22  ;;  %356 = vst.msk [vmem:[#allocation3 + $0x78] sm:$0xff] %vm340_vm0, %v818_v13 }
  0xa1   :  { %v255_v10 = vmul.f32 %v239_v7, %v239_v7 }
  0xa2   :  { %v216_v16 = vpop.permute.xlu2 %215  ;;  %v258_v18 = vmul.f32 %v242_v11, %v242_v11 }
  0xa3   :  { %v942_v12 = vadd.f32 %v255_v10, %v158_v9  ;;  %v246_v40 = vsub.f32 %v216_v16, %v908_v22 }
  0xa4   :  { %v950_v30 = vadd.f32 %v258_v18, %v161_v24 }
  0xa5   :  { %291 = vmin.xlane.f32.xlu1 %v942_v12  ;;  %v262_v47 = vmul.f32 %v246_v40, %v246_v40  ;;  %v315_v61 = vmin.f32 %v918_v45, %v942_v12  ;;  %v317_v12 = vmin.f32 %v911_v27, %v936_v3 }
  0xa6   :  { %v208_v17 = vpop.permute.xlu0 %207 }
  0xa7   :  { %v244_v19 = vsub.f32 %v208_v17, %v908_v22  ;;  %v204_v21 = vpop.permute.xlu1 %203 }
  0xa8   :  { %v243_v23 = vsub.f32 %v204_v21, %v908_v22 }
  0xa9   :  { %v260_v26 = vmul.f32 %v244_v19, %v244_v19 }
  0xaa   :  { %v259_v29 = vmul.f32 %v243_v23, %v243_v23 }
  0xab   :  { %v276_v31 = vadd.f32 %v260_v26, %v163_v25  ;;  %v125_v34 = vpop.permute.xlu2 %124 }
  0xac   :  { %v275_v32 = vadd.f32 %v259_v29, %v162_v28  ;;  %v151_v0 = vsub.f32 %v125_v34, %v904_v20 }
  0xad   :  { %297 = vmin.xlane.f32.xlu1 %v950_v30  ;;  %301 = vmin.xlane.f32.xlu0 %v276_v31  ;;  %v320_v9 = vmin.f32 %v316_v5, %v276_v31 }
  0xae   :  { %299 = vmin.xlane.f32.xlu2 %v275_v32  ;;  %v228_v44 = vpop.permute.xlu0 %227  ;;  %v167_v6 = vmul.f32 %v151_v0, %v151_v0  ;;  %v319_v10 = vmin.f32 %v315_v61, %v275_v32  ;;  %v599_v32 = vld [vmem:[#allocation2] sm:$0x1] }
  0xaf   :  { %v249_v51 = vsub.f32 %v228_v44, %v908_v22 }
  0xb0   :  { %v110_v35 = vpop.permute.xlu1 %109 }
  0xb1   :  { %v148_v37 = vsub.f32 %v110_v35, %v904_v20  ;;  %v265_v55 = vmul.f32 %v249_v51, %v249_v51 }
  0xb3   :  { %v164_v38 = vmul.f32 %v148_v37, %v148_v37  ;;  %v130_v43 = vpop.permute.xlu2 %129 }
  0xb4   :  { %v152_v50 = vsub.f32 %v130_v43, %v904_v20 }
  0xb5   :  { %v277_v39 = vadd.f32 %v261_v36, %v164_v38 }
  0xb6   :  { %v168_v54 = vmul.f32 %v152_v50, %v152_v50 }
  0xb7   :  { %303 = vmin.xlane.f32.xlu1 %v277_v39  ;;  %v321_v18 = vmin.f32 %v317_v12, %v277_v39 }
  0xb8   :  { %v115_v41 = vpop.permute.xlu1 %114  ;;  %v281_v62 = vadd.f32 %v265_v55, %v168_v54 }
  0xb9   :  { %v149_v42 = vsub.f32 %v115_v41, %v904_v20  ;;  %v552_v41 = vld [vmem:[#allocation3 + $0x10] sm:$0xff] }
  0xbb   :  { %v165_v48 = vmul.f32 %v149_v42, %v149_v42 }
  0xbc   :  { %v232_v8 = vpop.permute.xlu2 %231 }
  0xbd   :  { %v278_v52 = vadd.f32 %v262_v47, %v165_v48  ;;  %v250_v14 = vsub.f32 %v232_v8, %v908_v22 }
  0xbf   :  { %305 = vmin.xlane.f32.xlu2 %v278_v52  ;;  %v266_v16 = vmul.f32 %v250_v14, %v250_v14  ;;  %v551_v14 = vld [vmem:[#allocation3 + $0x8] sm:$0xff] }
  0xc1   :  { %v220_v57 = vpop.permute.xlu1 %219 }
  0xc2   :  { %v247_v58 = vsub.f32 %v220_v57, %v908_v22 }
  0xc4   :  { %v263_v60 = vmul.f32 %v247_v58, %v247_v58 }
  0xc6   :  { %v279_v63 = vadd.f32 %v263_v60, %v166_v59 }
  0xc7   :  { %311 = vmin.xlane.f32.xlu2 %v281_v62 }
  0xc8   :  { %307 = vmin.xlane.f32.xlu0 %v279_v63  ;;  %v323_v15 = vmin.f32 %v319_v10, %v279_v63 }
  0xc9   :  { %v224_v1 = vpop.permute.xlu1 %223 }
  0xca   :  { %v248_v4 = vsub.f32 %v224_v1, %v908_v22  ;;  %v318_v22 = vmin.f32 %v928_v56, %v950_v30 }
  0xcc   :  { %v264_v7 = vmul.f32 %v248_v4, %v248_v4  ;;  %v322_v21 = vmin.f32 %v318_v22, %v278_v52 }
  0xce   :  { %v280_v11 = vadd.f32 %v264_v7, %v167_v6  ;;  %v550_v7 = vld [vmem:[#allocation3] sm:$0xff] }
  0xd0   :  { %309 = vmin.xlane.f32.xlu1 %v280_v11  ;;  %v324_v49 = vmin.f32 %v320_v9, %v280_v11 }
  0xd2   :  { %v327_v45 = vmin.f32 %v323_v15, %v324_v49  ;;  %v135_v2 = vpop.permute.xlu1 %134 }
  0xd3   :  { %v153_v17 = vsub.f32 %v135_v2, %v904_v20  ;;  %v325_v20 = vmin.f32 %v321_v18, %v281_v62 }
  0xd5   :  { %v169_v19 = vmul.f32 %v153_v17, %v153_v17 }
  0xd7   :  { %v282_v23 = vadd.f32 %v266_v16, %v169_v19 }
  0xd9   :  { %v326_v27 = vmin.f32 %v322_v21, %v282_v23  ;;  %313 = vmin.xlane.f32.xlu0 %v282_v23 }
  0xdb   :  { %v328_v56 = vmin.f32 %v325_v20, %v326_v27 }
  0xdd   :  { %v329_v3 = vmin.f32 %v327_v45, %v328_v56 }
  0xdf   :  { %v330_v24 = vrot.slane %v329_v3, 4 }
  0xe0   :  { %v288_v25 = vpop.xlane.xlu0 %287 }
  0xe1   :  { %v331_v26 = vmin.f32 %v329_v3, %v330_v24  ;;  %731 = vrsqrt.f32 %v288_v25  ;;  %vm389_vm1 = vcmp.eq.f32.partialorder %v288_v25, inf  ;;  %v392_v42 = vand.u32 2147483648, %v288_v25  ;;  %v553_v24 = vld [vmem:[#allocation3 + $0x18] sm:$0xff] }
  0xe2   :  { %vm391_vm2 = vcmp.eq.f32.partialorder %v288_v25, 0.0 }
  0xe3   :  { %v332_v28 = vrot.slane %v331_v26, 2 }
  0xe5   :  { %v333_v29 = vmin.f32 %v331_v26, %v332_v28 }
  0xe7   :  { %v732_v30 = vpop.eup %731  ;;  %v334_v31 = vrot.slane %v333_v29, 1 }
  0xe8   :  { %v383_v33 = vmul.f32 %v732_v30, %v288_v25 }
  0xe9   :  { %v335_v34 = vmin.f32 %v333_v29, %v334_v31 }
  0xea   :  { %v384_v35 = vmul.f32 %v732_v30, %v383_v33 }
  0xeb   :  { %v600_v36 = vmin.f32 %v599_v32, %v335_v34 }
  0xec   :  { %v385_v37 = vmul.f32 0.5, %v384_v35 }
  0xed   :  { %601 = vst [vmem:[#allocation2] sm:$0x1] %v600_v36 }
  0xee   :  { %v386_v38 = vsub.f32 1.5, %v385_v37 }
  0xf0   :  { %v387_v39 = vmul.f32 %v732_v30, %v386_v38 }
  0xf2   :  { %v388_v40 = vmul.f32 %v387_v39, %v288_v25 }
  0xf4   :  { %v390_v43 = vsel %vm389_vm1, %v288_v25, %v388_v40  ;;  %v730_v44 = vld [vmem:[#allocation2] ss:$0 sm:$0xff] }
  0xf5   :  { %v393_v46 = vsel %vm391_vm2, %v392_v42, %v390_v43  ;;  %667 = vst [vmem:[#allocation6] sm:$0xff] %v730_v44  ;;  %v555_v42 = vld [vmem:[#allocation3 + $0x28] sm:$0xff] }
  0xf6   :  { %v568_v47 = vadd.f32 %v552_v41, %v393_v46  ;;  %689 = dma.vmem_to_hbm [thread:$0]  %s685_s1, 128, %s687_s23, [#allocation7]  }
  0xf8   :  { %585 = vst.msk [vmem:[#allocation3 + $0x10] sm:$0xff] %vm340_vm0, %v568_v47 }
  0xfd   :  { %v284_v48 = vpop.xlane.xlu1 %283 }
  0xfe   :  { %733 = vrsqrt.f32 %v284_v48  ;;  %v286_v50 = vpop.xlane.xlu2 %285  ;;  %vm365_vm3 = vcmp.eq.f32.partialorder %v284_v48, inf  ;;  %vm367_vm4 = vcmp.eq.f32.partialorder %v284_v48, 0.0  ;;  %v368_v8 = vand.u32 2147483648, %v284_v48 }
  0xff   :  { %735 = vrsqrt.f32 %v286_v50  ;;  %vm377_vm5 = vcmp.eq.f32.partialorder %v286_v50, inf  ;;  %v380_v15 = vand.u32 2147483648, %v286_v50  ;;  %vm379_vm6 = vcmp.eq.f32.partialorder %v286_v50, 0.0 }
 0x104   :  { %v734_v51 = vpop.eup %733 }
 0x105   :  { %v736_v52 = vpop.eup %735  ;;  %v359_v53 = vmul.f32 %v734_v51, %v284_v48 }
 0x106   :  { %v371_v54 = vmul.f32 %v736_v52, %v286_v50  ;;  %v290_v55 = vpop.xlane.xlu2 %289 }
 0x107   :  { %v360_v57 = vmul.f32 %v734_v51, %v359_v53  ;;  %737 = vrsqrt.f32 %v290_v55  ;;  %vm401_vm7 = vcmp.eq.f32.partialorder %v290_v55, inf  ;;  %v404_v25 = vand.u32 2147483648, %v290_v55 }
 0x108   :  { %v372_v58 = vmul.f32 %v736_v52, %v371_v54  ;;  %vm403_vm8 = vcmp.eq.f32.partialorder %v290_v55, 0.0 }
 0x109   :  { %v361_v59 = vmul.f32 0.5, %v360_v57 }
 0x10a   :  { %v373_v60 = vmul.f32 0.5, %v372_v58 }
 0x10b   :  { %v362_v62 = vsub.f32 1.5, %v361_v59 }
 0x10c   :  { %v374_v63 = vsub.f32 1.5, %v373_v60 }
 0x10d   :  { %v738_v0 = vpop.eup %737  ;;  %v363_v1 = vmul.f32 %v734_v51, %v362_v62  ;;  %v556_v51 = vld [vmem:[#allocation3 + $0x30] sm:$0xff] }
 0x10e   :  { %v375_v4 = vmul.f32 %v736_v52, %v374_v63  ;;  %v395_v5 = vmul.f32 %v738_v0, %v290_v55  ;;  %v990_v61 = vpop.xlane.xlu2 %293 }
 0x10f   :  { %v364_v6 = vmul.f32 %v363_v1, %v284_v48  ;;  %739 = vrsqrt.f32 %v990_v61  ;;  %vm425_vm9 = vcmp.eq.f32.partialorder %v990_v61, inf  ;;  %vm427_vm10 = vcmp.eq.f32.partialorder %v990_v61, 0.0 }
 0x110   :  { %v376_v9 = vmul.f32 %v375_v4, %v286_v50  ;;  %v396_v10 = vmul.f32 %v738_v0, %v395_v5  ;;  %v993_v11 = vpop.xlane.xlu0 %295  ;;  %v428_v43 = vand.u32 2147483648, %v990_v61 }
 0x111   :  { %v366_v13 = vsel %vm365_vm3, %v284_v48, %v364_v6  ;;  %741 = vrsqrt.f32 %v993_v11  ;;  %vm437_vm11 = vcmp.eq.f32.partialorder %v993_v11, inf  ;;  %vm439_vm12 = vcmp.eq.f32.partialorder %v993_v11, 0.0 }
 0x112   :  { %v369_v49 = vsel %vm367_vm4, %v368_v8, %v366_v13  ;;  %v378_v45 = vsel %vm377_vm5, %v286_v50, %v376_v9  ;;  %v397_v2 = vmul.f32 0.5, %v396_v10  ;;  %v440_v52 = vand.u32 2147483648, %v993_v11 }
 0x113   :  { %v566_v12 = vadd.f32 %v550_v7, %v369_v49  ;;  %v381_v16 = vsel %vm379_vm6, %v380_v15, %v378_v45  ;;  %v554_v7 = vld [vmem:[#allocation3 + $0x20] sm:$0xff] }
 0x114   :  { %v567_v17 = vadd.f32 %v551_v14, %v381_v16  ;;  %v398_v22 = vsub.f32 1.5, %v397_v2 }
 0x115   :  { %v740_v18 = vpop.eup %739  ;;  %583 = vst.msk [vmem:[#allocation3] sm:$0xff] %vm340_vm0, %v566_v12 }
 0x116   :  { %584 = vst.msk [vmem:[#allocation3 + $0x8] sm:$0xff] %vm340_vm0, %v567_v17  ;;  %v399_v19 = vmul.f32 %v738_v0, %v398_v22  ;;  %v419_v21 = vmul.f32 %v740_v18, %v990_v61 }
 0x117   :  { %v742_v23 = vpop.eup %741 }
 0x118   :  { %v400_v20 = vmul.f32 %v399_v19, %v290_v55  ;;  %v420_v27 = vmul.f32 %v740_v18, %v419_v21  ;;  %v431_v56 = vmul.f32 %v742_v23, %v993_v11  ;;  %v1000_v3 = vpop.xlane.xlu1 %291 }
 0x119   :  { %743 = vrsqrt.f32 %v1000_v3  ;;  %vm413_vm13 = vcmp.eq.f32.partialorder %v1000_v3, inf  ;;  %v416_v8 = vand.u32 2147483648, %v1000_v3  ;;  %vm415_vm14 = vcmp.eq.f32.partialorder %v1000_v3, 0.0 }
 0x11a   :  { %v402_v26 = vsel %vm401_vm7, %v290_v55, %v400_v20  ;;  %v421_v28 = vmul.f32 0.5, %v420_v27  ;;  %v432_v29 = vmul.f32 %v742_v23, %v431_v56  ;;  %v557_v56 = vld [vmem:[#allocation3 + $0x38] sm:$0xff] }
 0x11b   :  { %v405_v30 = vsel %vm403_vm8, %v404_v25, %v402_v26  ;;  %v559_v26 = vld [vmem:[#allocation3 + $0x48] sm:$0xff] }
 0x11c   :  { %v569_v31 = vadd.f32 %v553_v24, %v405_v30  ;;  %v422_v32 = vsub.f32 1.5, %v421_v28  ;;  %v433_v33 = vmul.f32 0.5, %v432_v29 }
 0x11e   :  { %586 = vst.msk [vmem:[#allocation3 + $0x18] sm:$0xff] %vm340_vm0, %v569_v31  ;;  %v423_v34 = vmul.f32 %v740_v18, %v422_v32  ;;  %v434_v35 = vsub.f32 1.5, %v433_v33 }
 0x11f   :  { %v744_v36 = vpop.eup %743 }
 0x120   :  { %v424_v37 = vmul.f32 %v423_v34, %v990_v61  ;;  %v435_v38 = vmul.f32 %v742_v23, %v434_v35  ;;  %v407_v39 = vmul.f32 %v744_v36, %v1000_v3  ;;  %v1006_v40 = vpop.xlane.xlu1 %297  ;;  %v1008_v41 = vpop.xlane.xlu0 %301  ;;  %v558_v35 = vld [vmem:[#allocation3 + $0x40] sm:$0xff] }
 0x121   :  { %745 = vrsqrt.f32 %v1006_v40  ;;  %v1014_v44 = vpop.xlane.xlu2 %299  ;;  %vm449_vm15 = vcmp.eq.f32.partialorder %v1006_v40, inf  ;;  %vm451_vm1 = vcmp.eq.f32.partialorder %v1006_v40, 0.0  ;;  %v452_v23 = vand.u32 2147483648, %v1006_v40 }
 0x122   :  { %v426_v46 = vsel %vm425_vm9, %v990_v61, %v424_v37  ;;  %v436_v47 = vmul.f32 %v435_v38, %v993_v11  ;;  %v408_v48 = vmul.f32 %v744_v36, %v407_v39  ;;  %747 = vrsqrt.f32 %v1008_v41 }
 0x123   :  { %v429_v50 = vsel %vm427_vm10, %v428_v43, %v426_v46  ;;  %749 = vrsqrt.f32 %v1014_v44  ;;  %vm473_vm2 = vcmp.eq.f32.partialorder %v1008_v41, inf  ;;  %vm475_vm3 = vcmp.eq.f32.partialorder %v1008_v41, 0.0 }
 0x124   :  { %v571_v53 = vadd.f32 %v555_v42, %v429_v50  ;;  %v438_v54 = vsel %vm437_vm11, %v993_v11, %v436_v47  ;;  %v409_v55 = vmul.f32 0.5, %v408_v48  ;;  %v476_v28 = vand.u32 2147483648, %v1008_v41 }
 0x125   :  { %v441_v57 = vsel %vm439_vm12, %v440_v52, %v438_v54  ;;  %vm461_vm4 = vcmp.eq.f32.partialorder %v1014_v44, inf  ;;  %vm463_vm5 = vcmp.eq.f32.partialorder %v1014_v44, 0.0  ;;  %v560_v52 = vld [vmem:[#allocation3 + $0x50] sm:$0xff] }
 0x126   :  { %588 = vst.msk [vmem:[#allocation3 + $0x28] sm:$0xff] %vm340_vm0, %v571_v53  ;;  %v572_v58 = vadd.f32 %v556_v51, %v441_v57  ;;  %v410_v59 = vsub.f32 1.5, %v409_v55  ;;  %v605_v57 = vld [vmem:[#allocation3] sm:$0xff] }
 0x127   :  { %v746_v60 = vpop.eup %745 }
 0x128   :  { %v748_v62 = vpop.eup %747  ;;  %589 = vst.msk [vmem:[#allocation3 + $0x30] sm:$0xff] %vm340_vm0, %v572_v58  ;;  %v411_v63 = vmul.f32 %v744_v36, %v410_v59  ;;  %v443_v0 = vmul.f32 %v746_v60, %v1006_v40  ;;  %v464_v36 = vand.u32 2147483648, %v1014_v44  ;;  %v606_v58 = vld [vmem:[#allocation3 + $0x8] sm:$0xff] }
 0x129   :  { %v467_v1 = vmul.f32 %v748_v62, %v1008_v41  ;;  %v750_v4 = vpop.eup %749 }
 0x12a   :  { %v412_v5 = vmul.f32 %v411_v63, %v1000_v3  ;;  %v444_v61 = vmul.f32 %v746_v60, %v443_v0  ;;  %v1030_v6 = vpop.xlane.xlu1 %303  ;;  %v455_v10 = vmul.f32 %v750_v4, %v1014_v44  ;;  %v621_v0 = vsel %vm340_vm0, %v605_v57, 0.0 }
 0x12b   :  { %v468_v9 = vmul.f32 %v748_v62, %v467_v1  ;;  %751 = vrsqrt.f32 %v1030_v6  ;;  %vm485_vm6 = vcmp.eq.f32.partialorder %v1030_v6, inf  ;;  %v488_v53 = vand.u32 2147483648, %v1030_v6 }
 0x12c   :  { %v414_v11 = vsel %vm413_vm13, %v1000_v3, %v412_v5  ;;  %v445_v13 = vmul.f32 0.5, %v444_v61  ;;  %v456_v49 = vmul.f32 %v750_v4, %v455_v10  ;;  %vm487_vm7 = vcmp.eq.f32.partialorder %v1030_v6, 0.0  ;;  %v607_v10 = vld [vmem:[#allocation3 + $0x10] sm:$0xff] }
 0x12d   :  { %v417_v14 = vsel %vm415_vm14, %v416_v8, %v414_v11  ;;  %v469_v15 = vmul.f32 0.5, %v468_v9  ;;  %v622_v1 = vsel %vm340_vm0, %v606_v58, 0.0  ;;  %v608_v11 = vld [vmem:[#allocation3 + $0x18] sm:$0xff] }
 0x12e   :  { %v570_v45 = vadd.f32 %v554_v7, %v417_v14  ;;  %v446_v2 = vsub.f32 1.5, %v445_v13  ;;  %v457_v16 = vmul.f32 0.5, %v456_v49  ;;  %v623_v13 = vadd.f32 %v622_v1, %v621_v0  ;;  %v561_v14 = vld [vmem:[#allocation3 + $0x58] sm:$0xff] }
 0x12f   :  { %v470_v12 = vsub.f32 1.5, %v469_v15 }
 0x130   :  { %587 = vst.msk [vmem:[#allocation3 + $0x20] sm:$0xff] %vm340_vm0, %v570_v45  ;;  %v447_v17 = vmul.f32 %v746_v60, %v446_v2  ;;  %v458_v19 = vsub.f32 1.5, %v457_v16 }
 0x131   :  { %v752_v22 = vpop.eup %751  ;;  %v471_v18 = vmul.f32 %v748_v62, %v470_v12 }
 0x132   :  { %v448_v21 = vmul.f32 %v447_v17, %v1006_v40  ;;  %v479_v20 = vmul.f32 %v752_v22, %v1030_v6  ;;  %v1043_v27 = vpop.xlane.xlu2 %305  ;;  %v459_v24 = vmul.f32 %v750_v4, %v458_v19 }
 0x133   :  { %v472_v3 = vmul.f32 %v471_v18, %v1008_v41  ;;  %753 = vrsqrt.f32 %v1043_v27  ;;  %vm497_vm8 = vcmp.eq.f32.partialorder %v1043_v27, inf  ;;  %v500_v15 = vand.u32 2147483648, %v1043_v27 }
 0x134   :  { %v450_v25 = vsel %vm449_vm15, %v1006_v40, %v448_v21  ;;  %v480_v29 = vmul.f32 %v752_v22, %v479_v20  ;;  %v460_v32 = vmul.f32 %v459_v24, %v1014_v44  ;;  %vm499_vm9 = vcmp.eq.f32.partialorder %v1043_v27, 0.0 }
 0x135   :  { %v453_v30 = vsel %vm451_vm1, %v452_v23, %v450_v25  ;;  %v474_v31 = vsel %vm473_vm2, %v1008_v41, %v472_v3  ;;  %v626_v18 = vsel %vm340_vm0, %v608_v11, 0.0 }
 0x136   :  { %v573_v33 = vadd.f32 %v557_v56, %v453_v30  ;;  %v477_v34 = vsel %vm475_vm3, %v476_v28, %v474_v31  ;;  %v481_v37 = vmul.f32 0.5, %v480_v29  ;;  %v462_v39 = vsel %vm461_vm4, %v1014_v44, %v460_v32  ;;  %v564_v31 = vld [vmem:[#allocation3 + $0x70] sm:$0xff] }
 0x137   :  { %v575_v38 = vadd.f32 %v559_v26, %v477_v34  ;;  %v465_v40 = vsel %vm463_vm5, %v464_v36, %v462_v39  ;;  %v609_v12 = vld [vmem:[#allocation3 + $0x20] sm:$0xff] }
 0x138   :  { %590 = vst.msk [vmem:[#allocation3 + $0x38] sm:$0xff] %vm340_vm0, %v573_v33  ;;  %v482_v42 = vsub.f32 1.5, %v481_v37  ;;  %v574_v43 = vadd.f32 %v558_v35, %v465_v40  ;;  %v628_v56 = vsel %vm340_vm0, %v609_v12, 0.0  ;;  %v610_v35 = vld [vmem:[#allocation3 + $0x28] sm:$0xff]  ;;  %v562_v37 = vld [vmem:[#allocation3 + $0x60] sm:$0xff] }
 0x139   :  { %v754_v41 = vpop.eup %753  ;;  %592 = vst.msk [vmem:[#allocation3 + $0x48] sm:$0xff] %vm340_vm0, %v575_v38 }
 0x13a   :  { %v483_v46 = vmul.f32 %v752_v22, %v482_v42  ;;  %v491_v47 = vmul.f32 %v754_v41, %v1043_v27  ;;  %v1060_v48 = vpop.xlane.xlu2 %311  ;;  %591 = vst.msk [vmem:[#allocation3 + $0x40] sm:$0xff] %vm340_vm0, %v574_v43  ;;  %v624_v22 = vsel %vm340_vm0, %v607_v10, 0.0 }
 0x13b   :  { %755 = vrsqrt.f32 %v1060_v48  ;;  %v1064_v50 = vpop.xlane.xlu0 %307  ;;  %v625_v23 = vadd.f32 %v624_v22, %v623_v13  ;;  %vm533_vm10 = vcmp.eq.f32.partialorder %v1060_v48, inf  ;;  %v536_v32 = vand.u32 2147483648, %v1060_v48 }
 0x13c   :  { %v484_v44 = vmul.f32 %v483_v46, %v1030_v6  ;;  %v492_v51 = vmul.f32 %v754_v41, %v491_v47  ;;  %757 = vrsqrt.f32 %v1064_v50  ;;  %vm535_vm11 = vcmp.eq.f32.partialorder %v1060_v48, 0.0 }
 0x13d   :  { %v627_v25 = vadd.f32 %v626_v18, %v625_v23  ;;  %vm509_vm12 = vcmp.eq.f32.partialorder %v1064_v50, inf  ;;  %v512_v38 = vand.u32 2147483648, %v1064_v50  ;;  %vm511_vm13 = vcmp.eq.f32.partialorder %v1064_v50, 0.0 }
 0x13e   :  { %v486_v54 = vsel %vm485_vm6, %v1030_v6, %v484_v44  ;;  %v493_v55 = vmul.f32 0.5, %v492_v51  ;;  %v630_v46 = vsel %vm340_vm0, %v610_v35, 0.0  ;;  %v611_v51 = vld [vmem:[#allocation3 + $0x30] sm:$0xff] }
 0x13f   :  { %v489_v59 = vsel %vm487_vm7, %v488_v53, %v486_v54  ;;  %v629_v30 = vadd.f32 %v628_v56, %v627_v25 }
 0x140   :  { %v576_v60 = vadd.f32 %v560_v52, %v489_v59  ;;  %v494_v62 = vsub.f32 1.5, %v493_v55  ;;  %v612_v52 = vld [vmem:[#allocation3 + $0x38] sm:$0xff]  ;;  %v614_v10 = vld [vmem:[#allocation3 + $0x48] sm:$0xff] }
 0x141   :  { %v756_v63 = vpop.eup %755  ;;  %v634_v57 = vsel %vm340_vm0, %v612_v52, 0.0  ;;  %v613_v59 = vld [vmem:[#allocation3 + $0x40] sm:$0xff] }
 0x142   :  { %v758_v4 = vpop.eup %757  ;;  %593 = vst.msk [vmem:[#allocation3 + $0x50] sm:$0xff] %vm340_vm0, %v576_v60  ;;  %v495_v5 = vmul.f32 %v754_v41, %v494_v62  ;;  %v527_v61 = vmul.f32 %v756_v63, %v1060_v48  ;;  %v563_v62 = vld [vmem:[#allocation3 + $0x68] sm:$0xff] }
 0x143   :  { %v503_v7 = vmul.f32 %v758_v4, %v1064_v50  ;;  %v1077_v6 = vpop.xlane.xlu1 %309 }
 0x144   :  { %v496_v8 = vmul.f32 %v495_v5, %v1043_v27  ;;  %v528_v9 = vmul.f32 %v756_v63, %v527_v61  ;;  %759 = vrsqrt.f32 %v1077_v6  ;;  %vm521_vm14 = vcmp.eq.f32.partialorder %v1077_v6, inf }
 0x145   :  { %v504_v49 = vmul.f32 %v758_v4, %v503_v7  ;;  %vm523_vm15 = vcmp.eq.f32.partialorder %v1077_v6, 0.0  ;;  %v636_v7 = vsel %vm340_vm0, %v613_v59, 0.0 }
 0x146   :  { %v498_v45 = vsel %vm497_vm8, %v1043_v27, %v496_v8  ;;  %v529_v2 = vmul.f32 0.5, %v528_v9 }
 0x147   :  { %v501_v16 = vsel %vm499_vm9, %v500_v15, %v498_v45  ;;  %v505_v17 = vmul.f32 0.5, %v504_v49  ;;  %v638_v45 = vsel %vm340_vm0, %v614_v10, 0.0 }
 0x148   :  { %v577_v19 = vadd.f32 %v561_v14, %v501_v16  ;;  %v530_v21 = vsub.f32 1.5, %v529_v2  ;;  %v565_v2 = vld [vmem:[#allocation3 + $0x78] sm:$0xff] }
 0x149   :  { %v506_v20 = vsub.f32 1.5, %v505_v17  ;;  %v615_v11 = vld [vmem:[#allocation3 + $0x50] sm:$0xff] }
 0x14a   :  { %v760_v3 = vpop.eup %759  ;;  %594 = vst.msk [vmem:[#allocation3 + $0x58] sm:$0xff] %vm340_vm0, %v577_v19  ;;  %v531_v24 = vmul.f32 %v756_v63, %v530_v21  ;;  %v524_v63 = vand.u32 2147483648, %v1077_v6 }
 0x14b   :  { %v507_v27 = vmul.f32 %v758_v4, %v506_v20  ;;  %v515_v26 = vmul.f32 %v760_v3, %v1077_v6 }
 0x14c   :  { %v532_v28 = vmul.f32 %v531_v24, %v1060_v48  ;;  %v1092_v29 = vpop.xlane.xlu0 %313 }
 0x14d   :  { %v508_v33 = vmul.f32 %v507_v27, %v1064_v50  ;;  %v516_v34 = vmul.f32 %v760_v3, %v515_v26  ;;  %761 = vrsqrt.f32 %v1092_v29  ;;  %vm545_vm1 = vcmp.eq.f32.partialorder %v1092_v29, inf }
 0x14e   :  { %v534_v36 = vsel %vm533_vm10, %v1060_v48, %v532_v28  ;;  %v631_v48 = vadd.f32 %v630_v46, %v629_v30  ;;  %v548_v12 = vand.u32 2147483648, %v1092_v29  ;;  %vm547_vm2 = vcmp.eq.f32.partialorder %v1092_v29, 0.0 }
 0x14f   :  { %v537_v39 = vsel %vm535_vm11, %v536_v32, %v534_v36  ;;  %v510_v40 = vsel %vm509_vm12, %v1064_v50, %v508_v33  ;;  %v517_v42 = vmul.f32 0.5, %v516_v34  ;;  %v632_v50 = vsel %vm340_vm0, %v611_v51, 0.0 }
 0x150   :  { %v580_v41 = vadd.f32 %v564_v31, %v537_v39  ;;  %v513_v43 = vsel %vm511_vm13, %v512_v38, %v510_v40  ;;  %v633_v60 = vadd.f32 %v632_v50, %v631_v48 }
 0x151   :  { %v578_v47 = vadd.f32 %v562_v37, %v513_v43  ;;  %v518_v44 = vsub.f32 1.5, %v517_v42  ;;  %v616_v15 = vld [vmem:[#allocation3 + $0x58] sm:$0xff] }
 0x152   :  { %597 = vst.msk [vmem:[#allocation3 + $0x70] sm:$0xff] %vm340_vm0, %v580_v41  ;;  %v635_v4 = vadd.f32 %v634_v57, %v633_v60  ;;  %v642_v18 = vsel %vm340_vm0, %v616_v15, 0.0 }
 0x153   :  { %v762_v53 = vpop.eup %761  ;;  %595 = vst.msk [vmem:[#allocation3 + $0x60] sm:$0xff] %vm340_vm0, %v578_v47  ;;  %v519_v54 = vmul.f32 %v760_v3, %v518_v44 }
 0x154   :  { %v539_v55 = vmul.f32 %v762_v53, %v1092_v29  ;;  %v637_v13 = vadd.f32 %v636_v7, %v635_v4 }
 0x155   :  { %v520_v58 = vmul.f32 %v519_v54, %v1077_v6 }
 0x156   :  { %v540_v0 = vmul.f32 %v762_v53, %v539_v55  ;;  %v639_v17 = vadd.f32 %v638_v45, %v637_v13 }
 0x157   :  { %v522_v1 = vsel %vm521_vm14, %v1077_v6, %v520_v58  ;;  %v640_v6 = vsel %vm340_vm0, %v615_v11, 0.0 }
 0x158   :  { %v525_v5 = vsel %vm523_vm15, %v524_v63, %v522_v1  ;;  %v541_v61 = vmul.f32 0.5, %v540_v0  ;;  %v641_v21 = vadd.f32 %v640_v6, %v639_v17 }
 0x159   :  { %v579_v8 = vadd.f32 %v563_v62, %v525_v5  ;;  %v619_v27 = vld [vmem:[#allocation3 + $0x70] sm:$0xff] }
 0x15a   :  { %v542_v9 = vsub.f32 1.5, %v541_v61  ;;  %v617_v16 = vld [vmem:[#allocation3 + $0x60] sm:$0xff]  ;;  %v643_v3 = vadd.f32 %v642_v18, %v641_v21  ;;  %v648_v28 = vsel %vm340_vm0, %v619_v27, 0.0 }
 0x15b   :  { %596 = vst.msk [vmem:[#allocation3 + $0x68] sm:$0xff] %vm340_vm0, %v579_v8  ;;  %v644_v56 = vsel %vm340_vm0, %v617_v16, 0.0 }
 0x15c   :  { %v543_v14 = vmul.f32 %v762_v53, %v542_v9  ;;  %v645_v25 = vadd.f32 %v644_v56, %v643_v3 }
 0x15e   :  { %v544_v49 = vmul.f32 %v543_v14, %v1092_v29 }
 0x160   :  { %v546_v22 = vsel %vm545_vm1, %v1092_v29, %v544_v49 }
 0x161   :  { %v549_v19 = vsel %vm547_vm2, %v548_v12, %v546_v22 }
 0x162   :  { %v581_v23 = vadd.f32 %v565_v2, %v549_v19  ;;  %v618_v20 = vld [vmem:[#allocation3 + $0x68] sm:$0xff] }
 0x163   :  { %v646_v24 = vsel %vm340_vm0, %v618_v20, 0.0 }
 0x164   :  { %598 = vst.msk [vmem:[#allocation3 + $0x78] sm:$0xff] %vm340_vm0, %v581_v23  ;;  %v647_v26 = vadd.f32 %v646_v24, %v645_v25 }
 0x166   :  { %v649_v29 = vadd.f32 %v648_v28, %v647_v26 }
 0x16b   :  { %v620_v30 = vld [vmem:[#allocation3 + $0x78] sm:$0xff] }
 0x16c   :  { %v650_v31 = vsel %vm340_vm0, %v620_v30, 0.0 }
 0x16d   :  { %v651_v32 = vadd.f32 %v650_v31, %v649_v29 }
 0x16f   :  { %652 = vadd.xlane.f32.xlu1 %v651_v32 }
 0x1e2   :  { %v653_v33 = vpop.xlane.xlu1 %652 }
 0x1e3   :  { %v654_v34 = vrot.slane %v653_v33, 4 }
 0x1e5   :  { %v655_v35 = vadd.f32 %v654_v34, %v653_v33 }
 0x1e7   :  { %v656_v36 = vrot.slane %v655_v35, 2 }
 0x1e9   :  { %v657_v37 = vadd.f32 %v656_v36, %v655_v35 }
 0x1eb   :  { %v658_v38 = vrot.slane %v657_v37, 1 }
 0x1ed   :  { %v659_v39 = vadd.f32 %v658_v38, %v657_v37 }
 0x1ef   :  { %706 = vpush %v659_v39 }
 0x220   :  { %s707_s29 = spop %706 }
 0x221   :  { %v661_v40 = vstv %s707_s29 }
 0x222   :  { %662 = vst [vmem:[#allocation4] sm:$0xff] %v661_v40 }
 0x223   :  { %678 = dma.vmem_to_hbm [thread:$0]  %s674_s28, 128, %s676_s26, [#allocation5]  }
 0x224   :  { %811 = dma.done.wait [#allocation5], 128  }
 0x225   :  { %812 = vsyncadd [#allocation5], 4294967168 }
 0x226   :  { %813 = dma.done.wait [#allocation7], 128  }
 0x227   :  { %814 = vsyncadd [#allocation7], 4294967168 }
 0x228   :  { %698 = vsyncpa [#allocation5], 1 }
 0x229   :  { %699 = vsyncpa [#allocation7], 1 }

</bundles_post_ra>
